<compile_context>
chip_gen: v7x
topology: tpu7x:2x2x1
jax: 0.10.0
libtpu: 0.0.40
codegen_flags: <defaults>
</compile_context>

<pallas_src>
import jax
import jax.numpy as jnp
from jax.experimental import pallas as pl
from jax.experimental.pallas import tpu as pltpu


def _make_ce_kernel(B_actual: int, Bp: int, tb: int, pad_b: bool,
                    cast_matmul_to_bf16: bool):
    """Builds the kernel body with static shape / masking policy baked in."""

    def kernel(temp_ref, tar_ref, qry_ref, out_ref,
               col_m_ref, col_l_ref, acc_row_ref, acc_diag_ref):
        # temp_ref     : SMEM (1, 1) f32            -- temperature
        # tar_ref      : VMEM (tb, Dp) native dtype -- row tile of tar_img_feat
        # qry_ref      : VMEM (Bp, Dp) native dtype -- full query_feat (resident)
        # out_ref      : SMEM (1, 1) f32            -- scalar loss
        # col_m_ref    : VMEM (1, Bp) f32 scratch   -- online column max
        # col_l_ref    : VMEM (1, Bp) f32 scratch   -- online column exp-sum
        # acc_row_ref  : VMEM (tb, 1) f32 scratch   -- partials of (row_lse - diag)
        # acc_diag_ref : VMEM (tb, 1) f32 scratch   -- partials of diag
        i = pl.program_id(0)
        n_tiles = pl.num_programs(0)

        @pl.when(i == 0)
        def _init():
            col_m_ref[...] = jnp.full(col_m_ref.shape, -jnp.inf, jnp.float32)
            col_l_ref[...] = jnp.zeros(col_l_ref.shape, jnp.float32)
            acc_row_ref[...] = jnp.zeros(acc_row_ref.shape, jnp.float32)
            acc_diag_ref[...] = jnp.zeros(acc_diag_ref.shape, jnp.float32)

        inv_temp = (1.0 / temp_ref[0, 0]).astype(jnp.float32)

        t_op = tar_ref[...]
        q_op = qry_ref[...]
        if cast_matmul_to_bf16 and t_op.dtype != jnp.bfloat16:
            t_op = t_op.astype(jnp.bfloat16)
            q_op = q_op.astype(jnp.bfloat16)

        # MXU: contract the feature dim of BOTH operands (no explicit transpose
        # of query_feat), f32 accumulation. 1/temp is folded into the f32 result
        # on the VPU (tb*Bp mults), so no requantization of the operands.
        s = jax.lax.dot_general(
            t_op, q_op,
            dimension_numbers=(((1,), (1,)), ((), ())),
            preferred_element_type=jnp.float32,
        ) * inv_temp  # (tb, Bp) f32

        # Diagonal ("correct class") logits for this row tile, computed directly
        # as <t_r, q_r> / temp via elementwise product + row-sum (all f32).
        start = pl.multiple_of(i * tb, tb)
        q_diag = qry_ref[pl.ds(start, tb), :].astype(jnp.float32)
        diag = jnp.sum(tar_ref[...].astype(jnp.float32) * q_diag,
                       axis=1, keepdims=True) * inv_temp  # (tb, 1)

        if pad_b:
            # Tile-sized validity masks (only emitted when B was padded).
            col_valid = (jax.lax.broadcasted_iota(jnp.int32, (tb, Bp), 1)
                         < B_actual)
            row_ids = i * tb + jax.lax.broadcasted_iota(jnp.int32, (tb, 1), 0)
            row_valid = row_ids < B_actual
            s_row = jnp.where(col_valid, s, -jnp.inf)
            s_col = jnp.where(row_valid, s, -jnp.inf)
        else:
            row_valid = None
            s_row = s
            s_col = s

        # --- Row direction (t2q): exact LSE (full row lives in this tile). ---
        m_r = jnp.max(s_row, axis=1, keepdims=True)
        l_r = jnp.sum(jnp.exp(s_row - m_r), axis=1, keepdims=True)
        row_lse = m_r + jnp.log(l_r)  # (tb, 1)

        contrib_row = row_lse - diag
        contrib_diag = diag
        if pad_b:
            zero = jnp.zeros_like(contrib_row)
            contrib_row = jnp.where(row_valid, contrib_row, zero)
            contrib_diag = jnp.where(row_valid, contrib_diag, zero)

        # Vector accumulators: no extra cross-lane reduction or SMEM round trip
        # per grid step; reduced to scalars once in the finalize step.
        acc_row_ref[...] += contrib_row
        acc_diag_ref[...] += contrib_diag

        # --- Column direction (q2t): online LSE across row tiles. ---
        m_tile = jnp.max(s_col, axis=0, keepdims=True)            # (1, Bp)
        m_new = jnp.maximum(col_m_ref[...], m_tile)
        col_l_ref[...] = (col_l_ref[...] * jnp.exp(col_m_ref[...] - m_new)
                          + jnp.sum(jnp.exp(s_col - m_new), axis=0,
                                    keepdims=True))
        col_m_ref[...] = m_new

        @pl.when(i == n_tiles - 1)
        def _finalize():
            col_lse = col_m_ref[...] + jnp.log(col_l_ref[...])    # (1, Bp)
            if pad_b:
                col_mask = (jax.lax.broadcasted_iota(jnp.int32, (1, Bp), 1)
                            < B_actual)
                col_lse = jnp.where(col_mask, col_lse, jnp.zeros_like(col_lse))
            inv_b = jnp.float32(1.0 / B_actual)
            sum_diag = jnp.sum(acc_diag_ref[...])
            loss_t2q = jnp.sum(acc_row_ref[...]) * inv_b
            loss_q2t = (jnp.sum(col_lse) - sum_diag) * inv_b
            out_ref[0, 0] = (loss_t2q + loss_q2t) * 0.5

    return kernel


def _tpu_vmem_capacity_bytes() -> int:
    try:
        return int(pltpu.get_tpu_info().vmem_capacity_bytes)
    except Exception:
        return 128 * 1024 * 1024  # 128 MiB-class fallback (v5e/v6e)


def _round_up(x: int, m: int) -> int:
    return -(-x // m) * m


def _pick_row_tile(B: int, vmem_cap: int) -> int:
    if B < 256:
        return B  # single row tile (block == full array dim is always legal)
    if vmem_cap <= 72 * 1024 * 1024:   # 64 MiB-class parts (v7x)
        return 128
    # 128 MiB-class parts: prefer 256 unless it forces noticeably more padding.
    pad256 = (-B) % 256
    pad128 = (-B) % 128
    return 128 if pad256 > pad128 else 256


def cross_entropy_loss(tar_img_feat: jax.Array, query_feat: jax.Array, temp,
                       *, row_tile: int | None = None,
                       cast_matmul_to_bf16: bool = False) -> jax.Array:
    """Pallas implementation of the contrastive CrossEntropyLoss.forward."""
    assert tar_img_feat.shape == query_feat.shape and tar_img_feat.ndim == 2
    B, D = tar_img_feat.shape

    vmem_cap = _tpu_vmem_capacity_bytes()
    tb = row_tile if row_tile is not None else _pick_row_tile(B, vmem_cap)
    Bp = _round_up(B, tb)                       # pad batch to a tile multiple
    Dp = _round_up(D, 128)                      # pad features to full lanes
    pad_b = Bp != B
    n_tiles = Bp // tb

    tar = tar_img_feat
    qry = query_feat
    if Bp != B or Dp != D:
        # Zero padding is exact for dot products; padded rows/cols are masked
        # out of the loss inside the kernel.
        tar = jnp.pad(tar, ((0, Bp - B), (0, Dp - D)))
        qry = jnp.pad(qry, ((0, Bp - B), (0, Dp - D)))

    temp_arr = jnp.asarray(temp, dtype=jnp.float32).reshape(1, 1)

    itemsize = jnp.dtype(tar.dtype).itemsize
    mm_itemsize = 2 if cast_matmul_to_bf16 else itemsize
    # Working-set estimate: single-buffered resident query, double-buffered tar
    # tile, the (tb, Bp) logit tile + exp temporaries, column scratch.
    est = (Bp * Dp * itemsize
           + 2 * tb * Dp * itemsize
           + 6 * tb * Bp * 4
           + 2 * tb * Bp * mm_itemsize
           + 8 * max(Bp, 128) * 4
           + 4 * tb * 4)
    vmem_limit = int(min(int(0.8 * vmem_cap),
                         max(32 * 1024 * 1024, 2 * est)))

    cost = pl.CostEstimate(
        flops=2 * Bp * Bp * Dp + 2 * Bp * Dp,
        transcendentals=2 * Bp * Bp,
        bytes_accessed=2 * Bp * Dp * itemsize + 8,
    )

    kernel = _make_ce_kernel(B, Bp, tb, pad_b, cast_matmul_to_bf16)

    out = pl.pallas_call(
        kernel,
        out_shape=jax.ShapeDtypeStruct((1, 1), jnp.float32),
        grid_spec=pltpu.PrefetchScalarGridSpec(
            num_scalar_prefetch=0,
            grid=(n_tiles,),
            in_specs=[
                pl.BlockSpec(memory_space=pltpu.MemorySpace.SMEM),   # temp
                pl.BlockSpec((tb, Dp), lambda i: (i, 0)),            # tar tile
                pl.BlockSpec((Bp, Dp), lambda i: (0, 0),             # resident q
                             pipeline_mode=pl.Buffered(1)),
            ],
            out_specs=pl.BlockSpec(memory_space=pltpu.MemorySpace.SMEM),
            scratch_shapes=[
                pltpu.VMEM((1, Bp), jnp.float32),    # online column max
                pltpu.VMEM((1, Bp), jnp.float32),    # online column exp-sum
                pltpu.VMEM((tb, 1), jnp.float32),    # (row_lse - diag) partials
                pltpu.VMEM((tb, 1), jnp.float32),    # diag partials
            ],
        ),
        compiler_params=pltpu.CompilerParams(
            # The single grid axis carries the online column reduction and the
            # row accumulators, so it must stay "arbitrary".
            dimension_semantics=("arbitrary",),
            vmem_limit_bytes=vmem_limit,
        ),
        cost_estimate=cost,
    )(temp_arr, tar, qry)
    return out[0, 0]


def _reference(tar, qry, temp):
    s = (tar.astype(jnp.float32) @ qry.astype(jnp.float32).T) / temp
    labels = jnp.arange(s.shape[0])

    def ce(logits):
        lse = jax.nn.logsumexp(logits, axis=1)
        correct = logits[jnp.arange(logits.shape[0]), labels]
        return jnp.mean(lse - correct)

    return (ce(s) + ce(s.T)) / 2.0


if __name__ == "__main__":
    key = jax.random.PRNGKey(0)
    k1, k2, k3, k4, k5, k6 = jax.random.split(key, 6)
    temp = 0.07

    # Small shape (single row tile, D zero-padded to 128 lanes).
    B, D = 8, 32
    tar_img_feat = jax.random.normal(k1, (B, D), dtype=jnp.float32)
    query_feat = jax.random.normal(k2, (B, D), dtype=jnp.float32)
    loss = cross_entropy_loss(tar_img_feat, query_feat, temp)
    jax.block_until_ready(loss)
    ref = _reference(tar_img_feat, query_feat, temp)
    assert jnp.allclose(loss, ref, rtol=1e-4, atol=1e-4), (loss, ref)

    # Multi-tile shape (exercises the online column log-sum-exp across tiles).
    B2, D2 = 384, 64
    tar2 = jax.random.normal(k3, (B2, D2), dtype=jnp.float32)
    qry2 = jax.random.normal(k4, (B2, D2), dtype=jnp.float32)
    tar2 = tar2 / jnp.linalg.norm(tar2, axis=-1, keepdims=True)
    qry2 = qry2 / jnp.linalg.norm(qry2, axis=-1, keepdims=True)
    loss2 = cross_entropy_loss(tar2, qry2, temp, row_tile=128)
    jax.block_until_ready(loss2)
    ref2 = _reference(tar2, qry2, temp)
    assert jnp.allclose(loss2, ref2, rtol=1e-4, atol=1e-3), (loss2, ref2)

    # Ragged batch (exercises zero-padding of B + the in-kernel validity masks).
    B3, D3 = 200, 48
    tar3 = jax.random.normal(k5, (B3, D3), dtype=jnp.float32)
    qry3 = jax.random.normal(k6, (B3, D3), dtype=jnp.float32)
    tar3 = tar3 / jnp.linalg.norm(tar3, axis=-1, keepdims=True)
    qry3 = qry3 / jnp.linalg.norm(qry3, axis=-1, keepdims=True)
    loss3 = cross_entropy_loss(tar3, qry3, temp, row_tile=128)
    jax.block_until_ready(loss3)
    ref3 = _reference(tar3, qry3, temp)
    assert jnp.allclose(loss3, ref3, rtol=1e-4, atol=1e-3), (loss3, ref3)

    print("KERNEL_OK")
</pallas_src>

<mosaic_0001>
module attributes {stable_mosaic.version = 11 : i64} {
  func.func @kernel(%arg0: i32, %arg1: memref<1x1xf32, #tpu.memory_space<smem>>, %arg2: memref<8x128xf32, #tpu.memory_space<vmem>>, %arg3: memref<8x128xf32, #tpu.memory_space<vmem>>, %arg4: memref<1x1xf32, #tpu.memory_space<smem>>, %arg5: memref<1x8xf32, #tpu.memory_space<vmem>>, %arg6: memref<1x8xf32, #tpu.memory_space<vmem>>, %arg7: memref<8x1xf32, #tpu.memory_space<vmem>>, %arg8: memref<8x1xf32, #tpu.memory_space<vmem>>) attributes {dimension_semantics = [#tpu.dimension_semantics<arbitrary>], iteration_bounds = array<i64: 1>, scalar_prefetch = 0 : i64, scratch_operands = 4 : i64, tpu.core_type = #tpu.core_type<tc>, window_params = [{transform_indices = @transform_0, window_bounds = array<i64: 1, 1>}, {transform_indices = @transform_1, window_bounds = array<i64: 8, 128>}, {pipeline_mode = #tpu.pipeline_mode<synchronous>, transform_indices = @transform_2, window_bounds = array<i64: 8, 128>}, {transform_indices = @transform_3, window_bounds = array<i64: 1, 1>}]} {
    %c0_i32 = arith.constant 0 : i32
    %0 = arith.cmpi eq, %arg0, %c0_i32 : i32
    %1 = arith.extui %0 : i1 to i32
    %c0_i32_0 = arith.constant 0 : i32
    %2 = arith.cmpi ne, %1, %c0_i32_0 : i32
    scf.if %2 {
      %cst_35 = arith.constant 0xFF800000 : f32
      %56 = vector.broadcast %cst_35 : f32 to vector<1x8xf32>
      %c0_36 = arith.constant 0 : index
      %c0_37 = arith.constant 0 : index
      %57 = vector.load %arg5[%c0_36, %c0_37] : memref<1x8xf32, #tpu.memory_space<vmem>>, vector<1x8xf32>
      tpu.vector_store %arg5[%c0_36, %c0_37], %56 {strides = array<i32>} : memref<1x8xf32, #tpu.memory_space<vmem>>, vector<1x8xf32>,
      %cst_38 = arith.constant 0.000000e+00 : f32
      %58 = vector.broadcast %cst_38 : f32 to vector<1x8xf32>
      %c0_39 = arith.constant 0 : index
      %c0_40 = arith.constant 0 : index
      %59 = vector.load %arg6[%c0_39, %c0_40] : memref<1x8xf32, #tpu.memory_space<vmem>>, vector<1x8xf32>
      tpu.vector_store %arg6[%c0_39, %c0_40], %58 {strides = array<i32>} : memref<1x8xf32, #tpu.memory_space<vmem>>, vector<1x8xf32>,
      %cst_41 = arith.constant 0.000000e+00 : f32
      %60 = vector.broadcast %cst_41 : f32 to vector<8x1xf32>
      %c0_42 = arith.constant 0 : index
      %c0_43 = arith.constant 0 : index
      %61 = vector.load %arg7[%c0_42, %c0_43] : memref<8x1xf32, #tpu.memory_space<vmem>>, vector<8x1xf32>
      tpu.vector_store %arg7[%c0_42, %c0_43], %60 {strides = array<i32>} : memref<8x1xf32, #tpu.memory_space<vmem>>, vector<8x1xf32>,
      %cst_44 = arith.constant 0.000000e+00 : f32
      %62 = vector.broadcast %cst_44 : f32 to vector<8x1xf32>
      %c0_45 = arith.constant 0 : index
      %c0_46 = arith.constant 0 : index
      %63 = vector.load %arg8[%c0_45, %c0_46] : memref<8x1xf32, #tpu.memory_space<vmem>>, vector<8x1xf32>
      tpu.vector_store %arg8[%c0_45, %c0_46], %62 {strides = array<i32>} : memref<8x1xf32, #tpu.memory_space<vmem>>, vector<8x1xf32>,
    } else {
    }
    %c0 = arith.constant 0 : index
    %c0_1 = arith.constant 0 : index
    %3 = memref.load %arg1[%c0, %c0_1] : memref<1x1xf32, #tpu.memory_space<smem>>
    %cst = arith.constant 1.000000e+00 : f32
    %4 = arith.divf %cst, %3 : f32
    %c0_2 = arith.constant 0 : index
    %c0_3 = arith.constant 0 : index
    %5 = vector.load %arg2[%c0_2, %c0_3] : memref<8x128xf32, #tpu.memory_space<vmem>>, vector<8x128xf32>
    %c0_4 = arith.constant 0 : index
    %c0_5 = arith.constant 0 : index
    %6 = vector.load %arg3[%c0_4, %c0_5] : memref<8x128xf32, #tpu.memory_space<vmem>>, vector<8x128xf32>
    %cst_6 = arith.constant dense<0.000000e+00> : vector<8x8xf32>
    %7 = tpu.matmul %5, %6, %cst_6 {dimension_numbers = #tpu.dot_dimension_numbers<[1], [1], [0], [0], [0, 0, 1, 0], [], []>} : vector<8x128xf32>, vector<8x128xf32>, vector<8x8xf32> -> vector<8x8xf32>
    %8 = vector.broadcast %4 : f32 to vector<8x8xf32>
    %9 = arith.mulf %7, %8 : vector<8x8xf32>
    %c8_i32 = arith.constant 8 : i32
    %10 = arith.muli %arg0, %c8_i32 : i32
    %11 = tpu.assume_multiple %10, 8 : i32
    %12 = arith.index_cast %11 : i32 to index
    %c0_7 = arith.constant 0 : index
    %13 = vector.load %arg3[%12, %c0_7] : memref<8x128xf32, #tpu.memory_space<vmem>>, vector<8x128xf32>
    %c0_8 = arith.constant 0 : index
    %c0_9 = arith.constant 0 : index
    %14 = vector.load %arg2[%c0_8, %c0_9] : memref<8x128xf32, #tpu.memory_space<vmem>>, vector<8x128xf32>
    %15 = arith.mulf %14, %13 : vector<8x128xf32>
    %cst_10 = arith.constant dense<0.000000e+00> : vector<8xf32>
    %16 = vector.multi_reduction <add>, %15, %cst_10 [1] : vector<8x128xf32> to vector<8xf32>
    %17 = vector.shape_cast %16 : vector<8xf32> to vector<8x1xf32>
    %18 = vector.broadcast %4 : f32 to vector<8x1xf32>
    %19 = arith.mulf %17, %18 : vector<8x1xf32>
    %cst_11 = arith.constant dense<0xFF800000> : vector<8xf32>
    %20 = vector.multi_reduction <maximumf>, %9, %cst_11 [1] : vector<8x8xf32> to vector<8xf32>
    %21 = vector.shape_cast %20 : vector<8xf32> to vector<8x1xf32>
    %22 = vector.broadcast %21 : vector<8x1xf32> to vector<8x8xf32>
    %23 = arith.subf %9, %22 : vector<8x8xf32>
    %24 = math.exp %23 : vector<8x8xf32>
    %cst_12 = arith.constant dense<0.000000e+00> : vector<8xf32>
    %25 = vector.multi_reduction <add>, %24, %cst_12 [1] : vector<8x8xf32> to vector<8xf32>
    %26 = vector.shape_cast %25 : vector<8xf32> to vector<8x1xf32>
    %27 = math.log %26 : vector<8x1xf32>
    %28 = arith.addf %21, %27 : vector<8x1xf32>
    %29 = arith.subf %28, %19 : vector<8x1xf32>
    %c0_13 = arith.constant 0 : index
    %c0_14 = arith.constant 0 : index
    %30 = vector.load %arg7[%c0_13, %c0_14] : memref<8x1xf32, #tpu.memory_space<vmem>>, vector<8x1xf32>
    %31 = arith.addf %30, %29 : vector<8x1xf32>
    %c0_15 = arith.constant 0 : index
    %c0_16 = arith.constant 0 : index
    %32 = vector.load %arg7[%c0_15, %c0_16] : memref<8x1xf32, #tpu.memory_space<vmem>>, vector<8x1xf32>
    tpu.vector_store %arg7[%c0_15, %c0_16], %31 {strides = array<i32>} : memref<8x1xf32, #tpu.memory_space<vmem>>, vector<8x1xf32>,
    %c0_17 = arith.constant 0 : index
    %c0_18 = arith.constant 0 : index
    %33 = vector.load %arg8[%c0_17, %c0_18] : memref<8x1xf32, #tpu.memory_space<vmem>>, vector<8x1xf32>
    %34 = arith.addf %33, %19 : vector<8x1xf32>
    %c0_19 = arith.constant 0 : index
    %c0_20 = arith.constant 0 : index
    %35 = vector.load %arg8[%c0_19, %c0_20] : memref<8x1xf32, #tpu.memory_space<vmem>>, vector<8x1xf32>
    tpu.vector_store %arg8[%c0_19, %c0_20], %34 {strides = array<i32>} : memref<8x1xf32, #tpu.memory_space<vmem>>, vector<8x1xf32>,
    %cst_21 = arith.constant dense<0xFF800000> : vector<8xf32>
    %36 = vector.multi_reduction <maximumf>, %9, %cst_21 [0] : vector<8x8xf32> to vector<8xf32>
    %37 = vector.shape_cast %36 : vector<8xf32> to vector<1x8xf32>
    %c0_22 = arith.constant 0 : index
    %c0_23 = arith.constant 0 : index
    %38 = vector.load %arg5[%c0_22, %c0_23] : memref<1x8xf32, #tpu.memory_space<vmem>>, vector<1x8xf32>
    %39 = arith.maximumf %38, %37 : vector<1x8xf32>
    %c0_24 = arith.constant 0 : index
    %c0_25 = arith.constant 0 : index
    %40 = vector.load %arg6[%c0_24, %c0_25] : memref<1x8xf32, #tpu.memory_space<vmem>>, vector<1x8xf32>
    %c0_26 = arith.constant 0 : index
    %c0_27 = arith.constant 0 : index
    %41 = vector.load %arg5[%c0_26, %c0_27] : memref<1x8xf32, #tpu.memory_space<vmem>>, vector<1x8xf32>
    %42 = arith.subf %41, %39 : vector<1x8xf32>
    %43 = math.exp %42 : vector<1x8xf32>
    %44 = arith.mulf %40, %43 : vector<1x8xf32>
    %45 = vector.broadcast %39 : vector<1x8xf32> to vector<8x8xf32>
    %46 = arith.subf %9, %45 : vector<8x8xf32>
    %47 = math.exp %46 : vector<8x8xf32>
    %cst_28 = arith.constant dense<0.000000e+00> : vector<8xf32>
    %48 = vector.multi_reduction <add>, %47, %cst_28 [0] : vector<8x8xf32> to vector<8xf32>
    %49 = vector.shape_cast %48 : vector<8xf32> to vector<1x8xf32>
    %50 = arith.addf %44, %49 : vector<1x8xf32>
    %c0_29 = arith.constant 0 : index
    %c0_30 = arith.constant 0 : index
    %51 = vector.load %arg6[%c0_29, %c0_30] : memref<1x8xf32, #tpu.memory_space<vmem>>, vector<1x8xf32>
    tpu.vector_store %arg6[%c0_29, %c0_30], %50 {strides = array<i32>} : memref<1x8xf32, #tpu.memory_space<vmem>>, vector<1x8xf32>,
    %c0_31 = arith.constant 0 : index
    %c0_32 = arith.constant 0 : index
    %52 = vector.load %arg5[%c0_31, %c0_32] : memref<1x8xf32, #tpu.memory_space<vmem>>, vector<1x8xf32>
    tpu.vector_store %arg5[%c0_31, %c0_32], %39 {strides = array<i32>} : memref<1x8xf32, #tpu.memory_space<vmem>>, vector<1x8xf32>,
    %c0_i32_33 = arith.constant 0 : i32
    %53 = arith.cmpi eq, %arg0, %c0_i32_33 : i32
    %54 = arith.extui %53 : i1 to i32
    %c0_i32_34 = arith.constant 0 : i32
    %55 = arith.cmpi ne, %54, %c0_i32_34 : i32
    scf.if %55 {
      %c0_35 = arith.constant 0 : index
      %c0_36 = arith.constant 0 : index
      %56 = vector.load %arg5[%c0_35, %c0_36] : memref<1x8xf32, #tpu.memory_space<vmem>>, vector<1x8xf32>
      %c0_37 = arith.constant 0 : index
      %c0_38 = arith.constant 0 : index
      %57 = vector.load %arg6[%c0_37, %c0_38] : memref<1x8xf32, #tpu.memory_space<vmem>>, vector<1x8xf32>
      %58 = math.log %57 : vector<1x8xf32>
      %59 = arith.addf %56, %58 : vector<1x8xf32>
      %c0_39 = arith.constant 0 : index
      %c0_40 = arith.constant 0 : index
      %60 = vector.load %arg8[%c0_39, %c0_40] : memref<8x1xf32, #tpu.memory_space<vmem>>, vector<8x1xf32>
      %61 = vector.shape_cast %60 : vector<8x1xf32> to vector<1x8x1xf32>
      %cst_41 = arith.constant dense<0.000000e+00> : vector<1xf32>
      %62 = vector.multi_reduction <add>, %61, %cst_41 [1, 2] : vector<1x8x1xf32> to vector<1xf32>
      %63 = vector.shape_cast %62 : vector<1xf32> to vector<1x1x1xf32>
      %64 = vector.extract %63[0, 0, 0] : f32 from vector<1x1x1xf32>
      %c0_42 = arith.constant 0 : index
      %c0_43 = arith.constant 0 : index
      %65 = vector.load %arg7[%c0_42, %c0_43] : memref<8x1xf32, #tpu.memory_space<vmem>>, vector<8x1xf32>
      %66 = vector.shape_cast %65 : vector<8x1xf32> to vector<1x8x1xf32>
      %cst_44 = arith.constant dense<0.000000e+00> : vector<1xf32>
      %67 = vector.multi_reduction <add>, %66, %cst_44 [1, 2] : vector<1x8x1xf32> to vector<1xf32>
      %68 = vector.shape_cast %67 : vector<1xf32> to vector<1x1x1xf32>
      %69 = vector.extract %68[0, 0, 0] : f32 from vector<1x1x1xf32>
      %cst_45 = arith.constant 1.250000e-01 : f32
      %70 = arith.mulf %69, %cst_45 : f32
      %71 = vector.shape_cast %59 : vector<1x8xf32> to vector<1x1x8xf32>
      %cst_46 = arith.constant dense<0.000000e+00> : vector<1xf32>
      %72 = vector.multi_reduction <add>, %71, %cst_46 [1, 2] : vector<1x1x8xf32> to vector<1xf32>
      %73 = vector.shape_cast %72 : vector<1xf32> to vector<1x1x1xf32>
      %74 = vector.extract %73[0, 0, 0] : f32 from vector<1x1x1xf32>
      %75 = arith.subf %74, %64 : f32
      %cst_47 = arith.constant 1.250000e-01 : f32
      %76 = arith.mulf %75, %cst_47 : f32
      %77 = arith.addf %70, %76 : f32
      %cst_48 = arith.constant 5.000000e-01 : f32
      %78 = arith.mulf %77, %cst_48 : f32
      %c0_49 = arith.constant 0 : index
      %c0_50 = arith.constant 0 : index
      %79 = memref.load %arg4[%c0_49, %c0_50] : memref<1x1xf32, #tpu.memory_space<smem>>
      memref.store %78, %arg4[%c0_49, %c0_50] : memref<1x1xf32, #tpu.memory_space<smem>>
    } else {
    }
    return
  }
  func.func @transform_0(%arg0: i32) -> (i32, i32) {
    %c0_i32 = arith.constant 0 : i32
    %c0_i32_0 = arith.constant 0 : i32
    %c0_i32_1 = arith.constant 0 : i32
    return %c0_i32, %c0_i32_0 : i32, i32
  }
  func.func @transform_1(%arg0: i32) -> (i32, i32) {
    %c0_i32 = arith.constant 0 : i32
    %c0_i32_0 = arith.constant 0 : i32
    return %arg0, %c0_i32 : i32, i32
  }
  func.func @transform_2(%arg0: i32) -> (i32, i32) {
    %c0_i32 = arith.constant 0 : i32
    %c0_i32_0 = arith.constant 0 : i32
    %c0_i32_1 = arith.constant 0 : i32
    return %c0_i32, %c0_i32_0 : i32, i32
  }
  func.func @transform_3(%arg0: i32) -> (i32, i32) {
    %c0_i32 = arith.constant 0 : i32
    %c0_i32_0 = arith.constant 0 : i32
    %c0_i32_1 = arith.constant 0 : i32
    return %c0_i32, %c0_i32_0 : i32, i32
  }
}

</mosaic_0001>

<bundles_post_ra>
// kernel: tpu_custom_call.1
= control target key start
LH: loop header
LB: loop body
LE: loop exit
PB: predicated region body
PF: predicated region fallthrough
CT: control target
= control target key end

     0   :  { %9 = vsyncpa [#allocation8], 0  ;;  %s427_s0 = inlined_call_operand.<no memory space> [shape: f32[1,1], index: 0, kind: input, shape index: {}]   ;;  %s428_s1 = inlined_call_operand.hbm [shape: f32[8,128], index: 1, kind: input, shape index: {}]   ;;  %s429_s2 = inlined_call_operand.hbm [shape: f32[8,128], index: 2, kind: input, shape index: {}]   ;;  %s430_s3 = inlined_call_operand.hbm [shape: f32[1,1], index: 3, kind: output, shape index: {}]  }
   0x1   :  { %10 = vsyncpa [#allocation11], 0 }
   0x2   :  { %11 = vsyncpa [#allocation9], 0  ;;  %s344_s12 = smov [#allocation7]   ;;  %s345_s14 = smov [#allocation10]  }
   0x3   :  { %s20_s13 = sshll.u32 %s344_s12, 4  ;;  %s30_s15 = sshll.u32 %s345_s14, 4  ;;  %s21_s13 = int_to_ptr.vmem [resolvable:$true] %s20_s13  ;;  %s31_s15 = int_to_ptr.vmem [resolvable:$true] %s30_s15 }
   0x4   :  { %s284_s18 = scalar_lea.hbm %s428_s1, 128 }
   0x5   :  { %p285_p0 = scmp.ne.s32.totalorder %s428_s1, %s284_s18  ;;  %p288_p1 = scmp.lt.u32.totalorder %s284_s18, %s428_s1 }
   0x7   :  { %p290_p2 = pnand %p288_p1, %p285_p0 }
   0x9   :  { %293 = shalt.err (!%p290_p2)
}
   0xa   :  { %s294_s23 = scalar_lea.vmem %s21_s13, 128  ;;  %p299_p4 = scmp.lt.s32.totalorder %s21_s13, %s21_s13 }
   0xb   :  { %p295_p3 = scmp.ne.s32.totalorder %s21_s13, %s294_s23  ;;  %p300_p5 = scmp.lt.s32.totalorder %s294_s23, %s294_s23 }
   0xd   :  { %p301_p6 = por %p300_p5, %p299_p4 }
   0xf   :  { %p302_p7 = pnand %p301_p6, %p295_p3 }
  0x11   :  { %305 = shalt.err (!%p302_p7)
}
  0x12   :  { %23 = dma.hbm_to_vmem [thread:$0]  %s428_s1, 128, %s21_s13, [#allocation8]  }
  0x13   :  { %s306_s28 = scalar_lea.hbm %s429_s2, 128 }
  0x14   :  { %p307_p8 = scmp.ne.s32.totalorder %s429_s2, %s306_s28  ;;  %p310_p9 = scmp.lt.u32.totalorder %s306_s28, %s429_s2 }
  0x16   :  { %p312_p10 = pnand %p310_p9, %p307_p8 }
  0x18   :  { %315 = shalt.err (!%p312_p10)
}
  0x19   :  { %s316_s6 = scalar_lea.vmem %s31_s15, 128  ;;  %p321_p12 = scmp.lt.s32.totalorder %s31_s15, %s31_s15 }
  0x1a   :  { %p317_p11 = scmp.ne.s32.totalorder %s31_s15, %s316_s6  ;;  %p322_p13 = scmp.lt.s32.totalorder %s316_s6, %s316_s6 }
  0x1c   :  { %p323_p0 = por %p322_p13, %p321_p12 }
  0x1e   :  { %p324_p1 = pnand %p323_p0, %p317_p11 }
  0x20   :  { %327 = shalt.err (!%p324_p1)
}
  0x21   :  { %33 = dma.hbm_to_vmem [thread:$0]  %s429_s2, 128, %s31_s15, [#allocation11]  }
  0x22   :  { %338 = dma.done.wait [#allocation8], 128  }
  0x23   :  { %339 = vsyncadd [#allocation8], 4294967168 }
  0x24   :  { %340 = dma.done.wait [#allocation11], 128  }
  0x25   :  { %341 = vsyncadd [#allocation11], 4294967168  ;;  %v51_v0 = vstv %s427_s0  ;;  %vm47_vm0 = vcmask 7168   ;;  %v346_v1 = vmov 0.0   ;;  %vm347_vm1 = vmmov 0   ;;  %v55_v2 = vld [vmem:[#allocation10] sm:$0xff] }
  0x26   :  { %253 = vmatprep.subr.mxu0 %v346_v1  ;;  %255 = vmatprep.mubr.msk.f32.mxu0 %vm347_vm1, %v346_v1  ;;  %272 = vrcp.f32 %v51_v0  ;;  %49 = vst.msk [vmem:[#allocation5] sm:$0xff] %vm47_vm0, %v346_v1  ;;  %48 = vst.msk [vmem:[#allocation4] sm:$0xff] %vm47_vm0, %v346_v1  ;;  %v54_v3 = vld [vmem:[#allocation7] sm:$0xff]  ;;  %vm44_vm2 = vcmask 57344   ;;  %v348_v6 = vmov -inf   ;;  %vm135_vm3 = vcmask 64512  }
  0x27   :  { %254 = vmatpush3.xpose.msra.mxu0 %v55_v2  ;;  %v131_v4 = vmul.f32 %v55_v2, %v54_v3  ;;  %45 = vst.msk [vmem:[#allocation2] sm:$0x1] %vm44_vm2, %v348_v6  ;;  %46 = vst.msk [vmem:[#allocation3] sm:$0x1] %vm44_vm2, %v346_v1  ;;  %v170_v19 = vlaneseq  ;;  %s328_s19 = scalar_lea.hbm %s430_s3, 16 }
  0x28   :  { %p329_p2 = scmp.ne.s32.totalorder %s430_s3, %s328_s19  ;;  %p332_p3 = scmp.lt.u32.totalorder %s328_s19, %s430_s3 }
  0x29   :  { %132 = vadd.xlane.f32.xlu1 %v131_v4  ;;  %v171_v22 = vshrl.u32 %v170_v19, 7 }
  0x2a   :  { %256 = vmatmul.mubr.f32.vlgmr.msra.gmra.mrb[0].mxu0 %v54_v3  ;;  %p334_p4 = pnand %p332_p3, %p329_p2 }
  0x2b   :  { %v172_v26 = vsub.s32 0, %v171_v22 }
  0x2d   :  { %v153_v9 = vld [vmem:[#allocation5] sm:$0xff]  ;;  %v149_v4 = vld [vmem:[#allocation4] sm:$0xff] }
  0x2e   :  { %v162_v25 = vld [vmem:[#allocation2] sm:$0x1]  ;;  %v164_v41 = vld [vmem:[#allocation3] sm:$0x1] }
  0x30   :  { %v273_v5 = vpop.eup %272 }
  0x31   :  { %258 = vpush %v273_v5 }
  0x62   :  { %s259_s0 = spop %258 }
  0x63   :  { %v126_v7 = vstv %s259_s0 }
  0xb6   :  { %v133_v8 = vpop.xlane.xlu1 %132 }
  0xb7   :  { %v401_v10 = vmul.f32 %v133_v8, %v126_v7 }
  0xb9   :  { %v154_v11 = vadd.f32 %v153_v9, %v401_v10 }
  0xbb   :  { %155 = vst.msk [vmem:[#allocation5] sm:$0xff] %vm47_vm0, %v154_v11 }
  0xc2   :  { %v197_v12 = vld [vmem:[#allocation5] sm:$0xff] }
  0xc3   :  { %v198_v13 = vsel %vm47_vm0, %v197_v12, 0.0 }
  0xc4   :  { %199 = vadd.xlane.f32.xlu1 %v198_v13 }
  0xfd   :  { %v122_v14 = vpop.f32.mrb[0].mxu0 }
  0xfe   :  { %v127_v15 = vmul.f32 %v126_v7, %v122_v14  ;;  %v257_v16 = vpop.f32.mrb[1].mxu0 }
 0x100   :  { %v136_v17 = vsel %vm135_vm3, %v127_v15, -inf }
 0x101   :  { %137 = vmax.xlane.f32.xlu0 %v136_v17  ;;  %v156_v18 = vrot.slane %v136_v17, 4 }
 0x103   :  { %v157_v20 = vmax.f32 %v136_v17, %v156_v18 }
 0x105   :  { %v158_v21 = vrot.slane %v157_v20, 2 }
 0x107   :  { %v159_v23 = vmax.f32 %v157_v20, %v158_v21 }
 0x109   :  { %v160_v24 = vrot.slane %v159_v23, 1 }
 0x10b   :  { %v161_v27 = vmax.f32 %v159_v23, %v160_v24 }
 0x10d   :  { %v163_v28 = vmax.f32 %v162_v25, %v161_v27 }
 0x10f   :  { %v173_v29 = vrot.slane %v163_v28, %v172_v26  ;;  %188 = vst.msk [vmem:[#allocation2] sm:$0x1] %vm44_vm2, %v163_v28  ;;  %v165_v32 = vsub.f32 %v162_v25, %v163_v28 }
 0x111   :  { %v175_v30 = vsub.f32 %v127_v15, %v173_v29  ;;  %v166_v33 = vmul.f32 1.442695, %v165_v32 }
 0x113   :  { %v176_v31 = vmul.f32 1.442695, %v175_v30 }
 0x115   :  { %274 = vpow2.f32 %v176_v31 }
 0x116   :  { %276 = vpow2.f32 %v166_v33  ;;  %v192_v49 = vld [vmem:[#allocation2] sm:$0x1] }
 0x11f   :  { %v275_v34 = vpop.eup %274 }
 0x120   :  { %v178_v35 = vsel %vm135_vm3, %v275_v34, 0.0  ;;  %v277_v40 = vpop.eup %276 }
 0x121   :  { %v179_v36 = vrot.slane %v178_v35, 4  ;;  %v168_v44 = vmul.f32 %v277_v40, %v164_v41 }
 0x123   :  { %v180_v37 = vadd.f32 %v179_v36, %v178_v35 }
 0x125   :  { %v181_v38 = vrot.slane %v180_v37, 2 }
 0x127   :  { %v182_v39 = vadd.f32 %v181_v38, %v180_v37 }
 0x129   :  { %v183_v42 = vrot.slane %v182_v39, 1 }
 0x12b   :  { %v184_v43 = vadd.f32 %v183_v42, %v182_v39 }
 0x12d   :  { %v185_v45 = vadd.f32 %v184_v43, %v168_v44 }
 0x12f   :  { %187 = vst.msk [vmem:[#allocation3] sm:$0x1] %vm44_vm2, %v185_v45 }
 0x136   :  { %v193_v46 = vld [vmem:[#allocation3] sm:$0x1] }
 0x137   :  { %278 = vlog2.f32 %v193_v46 }
 0x141   :  { %v279_v47 = vpop.eup %278 }
 0x142   :  { %v195_v48 = vmul.f32 0.6931472, %v279_v47 }
 0x144   :  { %v196_v50 = vadd.f32 %v195_v48, %v192_v49 }
 0x146   :  { %v220_v51 = vsel %vm44_vm2, %v196_v50, 0.0 }
 0x147   :  { %221 = vadd.xlane.f32.xlu1 %v220_v51 }
 0x151   :  { %v200_v52 = vpop.xlane.xlu1 %199 }
 0x152   :  { %v201_v53 = vrot.slane %v200_v52, 4 }
 0x154   :  { %v202_v54 = vadd.f32 %v201_v53, %v200_v52 }
 0x156   :  { %v203_v55 = vrot.slane %v202_v54, 2 }
 0x158   :  { %v204_v56 = vadd.f32 %v203_v55, %v202_v54 }
 0x15a   :  { %v205_v57 = vrot.slane %v204_v56, 1 }
 0x15c   :  { %v206_v58 = vadd.f32 %v205_v57, %v204_v56 }
 0x15e   :  { %260 = vpush %v206_v58 }
 0x18e   :  { %v138_v59 = vpop.xlane.xlu0 %137 }
 0x18f   :  { %v139_v60 = vsub.f32 %v127_v15, %v138_v59  ;;  %s261_s2 = spop %260 }
 0x191   :  { %v140_v61 = vmul.f32 1.442695, %v139_v60 }
 0x193   :  { %280 = vpow2.f32 %v140_v61 }
 0x19d   :  { %v281_v62 = vpop.eup %280 }
 0x19e   :  { %v142_v63 = vsel %vm135_vm3, %v281_v62, 0.0 }
 0x19f   :  { %143 = vadd.xlane.f32.xlu0 %v142_v63 }
 0x1d4   :  { %v222_v9 = vpop.xlane.xlu1 %221 }
 0x1d5   :  { %v223_v11 = vrot.slane %v222_v9, 4 }
 0x1d7   :  { %v224_v12 = vadd.f32 %v223_v11, %v222_v9 }
 0x1d9   :  { %v225_v13 = vrot.slane %v224_v12, 2 }
 0x1db   :  { %v226_v17 = vadd.f32 %v225_v13, %v224_v12 }
 0x1dd   :  { %v227_v20 = vrot.slane %v226_v17, 1 }
 0x1df   :  { %v228_v22 = vadd.f32 %v227_v20, %v226_v17 }
 0x22c   :  { %v144_v0 = vpop.xlane.xlu0 %143 }
 0x22d   :  { %282 = vlog2.f32 %v144_v0 }
 0x237   :  { %v283_v1 = vpop.eup %282 }
 0x238   :  { %v146_v2 = vmul.f32 0.6931472, %v283_v1 }
 0x23a   :  { %v147_v3 = vadd.f32 %v146_v2, %v138_v59 }
 0x23c   :  { %v148_v5 = vsub.f32 %v147_v3, %v401_v10 }
 0x23e   :  { %v150_v6 = vadd.f32 %v149_v4, %v148_v5 }
 0x240   :  { %152 = vst.msk [vmem:[#allocation4] sm:$0xff] %vm47_vm0, %v150_v6 }
 0x247   :  { %v208_v7 = vld [vmem:[#allocation4] sm:$0xff] }
 0x248   :  { %v209_v8 = vsel %vm47_vm0, %v208_v7, 0.0 }
 0x249   :  { %210 = vadd.xlane.f32.xlu0 %v209_v8 }
 0x2d6   :  { %v211_v14 = vpop.xlane.xlu0 %210 }
 0x2d7   :  { %v212_v15 = vrot.slane %v211_v14, 4 }
 0x2d9   :  { %v213_v16 = vadd.f32 %v212_v15, %v211_v14 }
 0x2db   :  { %v214_v18 = vrot.slane %v213_v16, 2 }
 0x2dd   :  { %v215_v19 = vadd.f32 %v214_v18, %v213_v16 }
 0x2df   :  { %v216_v21 = vrot.slane %v215_v19, 1 }
 0x2e1   :  { %v217_v10 = vadd.f32 %v216_v21, %v215_v19 }
 0x2e3   :  { %262 = vpush %v217_v10 }
 0x2e4   :  { %264 = vpush %v228_v22 }
 0x314   :  { %s263_s10 = spop %262 }
 0x315   :  { %s265_s11 = spop %264  ;;  %s219_s13 = smul.f32 0.125, %s263_s10 }
 0x316   :  { %s230_s12 = ssub.f32 %s265_s11, %s261_s2 }
 0x318   :  { %s231_s14 = smul.f32 0.125, %s230_s12 }
 0x31a   :  { %s232_s15 = sadd.f32 %s231_s14, %s219_s13 }
 0x31c   :  { %s233_s16 = smul.f32 0.5, %s232_s15 }
 0x31e   :  { %235 = sst [smem:[#allocation12]] %s233_s16 }
 0x31f   :  { %337 = shalt.err (!%p334_p4)
}
 0x320   :  { %s349_s24 = smov [#allocation12]  }
 0x321   :  { %243 = dma.smem_to_hbm %s349_s24, 16, %s430_s3, [#allocation9]  }
 0x322   :  { %342 = dma.done.wait [#allocation9], 16  }
 0x323   :  { %343 = vsyncadd [#allocation9], 4294967280 }
 0x324   :  { %247 = sfence }
 0x325   :  { %248 = vsyncpa [#allocation8], 1 }
 0x326   :  { %249 = vsyncpa [#allocation11], 1 }
 0x327   :  { %250 = vsyncpa [#allocation9], 1 }

</bundles_post_ra>
